<compile_context>
chip_gen: v7x
topology: tpu7x:2x2x1
jax: 0.10.0
libtpu: 0.0.40
codegen_flags: <defaults>
</compile_context>

<pallas_src>
import jax
import jax.numpy as jnp
from jax.experimental import pallas as pl
from jax.experimental.pallas import tpu as pltpu


def ssf2_kernel(layer_ref, x_ref, scale_ref, shift_ref, o_ref):
    # Layer selection happens in the BlockSpec index_maps (scalar prefetch);
    # the kernel body is a pure fused multiply-add computed in f32.
    del layer_ref
    x = x_ref[...].astype(jnp.float32)
    s = scale_ref[...].astype(jnp.float32)
    t = shift_ref[...].astype(jnp.float32)
    o_ref[...] = (x * s + t).astype(o_ref.dtype)


def _choose_block_rows(rows, lanes, requested=None):
    """Rows per tile: multiple of 8, ~2 MiB (f32 terms) per buffer, capped at rows."""
    if requested is not None:
        blk = requested
    else:
        blk = (2 * 1024 * 1024) // (lanes * 4)
        blk = max(8, (blk // 8) * 8)
    if blk >= rows:
        return rows  # full extent: always a legal block shape
    return max(8, (blk // 8) * 8)


def _ssf2_call(x3, scales3, shifts3, layer_idx, block_rows):
    B, rows, lanes = x3.shape
    blk_rows = _choose_block_rows(rows, lanes, block_rows)
    grid_r = pl.cdiv(rows, blk_rows)

    grid_spec = pltpu.PrefetchScalarGridSpec(
        num_scalar_prefetch=1,
        # Batch innermost (fastest-varying): the parameter block index
        # (layer, r, 0) is constant across the B consecutive steps, so the
        # params are fetched once per row-block instead of once per batch.
        grid=(grid_r, B),
        in_specs=[
            pl.BlockSpec((1, blk_rows, lanes), lambda r, b, l: (b, r, 0)),
            pl.BlockSpec((1, blk_rows, lanes), lambda r, b, l: (l[0], r, 0)),
            pl.BlockSpec((1, blk_rows, lanes), lambda r, b, l: (l[0], r, 0)),
        ],
        out_specs=pl.BlockSpec((1, blk_rows, lanes), lambda r, b, l: (b, r, 0)),
    )

    return pl.pallas_call(
        ssf2_kernel,
        out_shape=jax.ShapeDtypeStruct(x3.shape, x3.dtype),
        grid_spec=grid_spec,
        compiler_params=pltpu.CompilerParams(
            dimension_semantics=("parallel", "parallel"),
            # Above the 16/32 MiB scoped defaults, below v7x's 64 MiB physical.
            vmem_limit_bytes=48 * 1024 * 1024,
        ),
    )(layer_idx, x3, scales3, shifts3)


def ssf2_forward(x, scales, shifts, layer, *, block_rows=None):
    """x: [B, T, D]; scales/shifts: [L, T, D]; layer: scalar int.

    Returns x * scales[layer] + shifts[layer] (broadcast over batch).
    """
    B, T, D = x.shape
    L = scales.shape[0]
    layer_idx = jnp.asarray([layer], dtype=jnp.int32)

    N = T * D
    if N % 128 == 0:
        # Lane-dense view: fold (T, D) -> (N//128, 128). This is a pure
        # relabeling of the flattened per-batch index space, applied
        # identically to x and the parameters, so the elementwise semantics
        # are unchanged. Covers the production shape (T=1025, D=1024).
        rows = N // 128
        x3 = x.reshape(B, rows, 128)
        s3 = scales.reshape(L, rows, 128)
        t3 = shifts.reshape(L, rows, 128)
    else:
        # Fallback: keep (T, D). The last block dim equals D (full extent),
        # which is always legal but lane-sparse when D < 128.
        x3, s3, t3 = x, scales, shifts

    out = _ssf2_call(x3, s3, t3, layer_idx, block_rows)
    return out.reshape(B, T, D)


if __name__ == "__main__":
    key = jax.random.PRNGKey(0)
    k_scales, k_shifts, k_x = jax.random.split(key, 3)

    # Small shapes consistent with the module: layers=3, tokens=9 (8 patches
    # + 1 cls token, analogous to 1024 + 1 = 1025), dim=128 (small analog of
    # the default dim=1024; keeps the lane axis dense), batch=2.
    L, T, D, B = 3, 9, 128, 2
    scales = 1.0 + 0.02 * jax.random.normal(k_scales, (L, T, D), dtype=jnp.float32)
    shifts = 0.02 * jax.random.normal(k_shifts, (L, T, D), dtype=jnp.float32)
    x = jax.random.normal(k_x, (B, T, D), dtype=jnp.float32)

    layer = 1
    out = jax.block_until_ready(ssf2_forward(x, scales, shifts, layer))
    ref = x * scales[layer] + shifts[layer]
    assert out.shape == (B, T, D)
    assert jnp.allclose(out, ref, atol=1e-6, rtol=1e-6), "mismatch vs reference"

    # Exercise multi-block row tiling with a ragged tail: 9 folded rows tiled
    # into blocks of 8 -> 2 row-blocks, last one write-masked.
    out2 = jax.block_until_ready(ssf2_forward(x, scales, shifts, 2, block_rows=8))
    ref2 = x * scales[2] + shifts[2]
    assert jnp.allclose(out2, ref2, atol=1e-6, rtol=1e-6), "mismatch (ragged tiling)"

    # Exercise the lane-sparse fallback path (T*D not a multiple of 128).
    D2 = 32
    scales2 = 1.0 + 0.02 * jax.random.normal(k_scales, (L, T, D2), dtype=jnp.float32)
    shifts2 = 0.02 * jax.random.normal(k_shifts, (L, T, D2), dtype=jnp.float32)
    x2 = jax.random.normal(k_x, (B, T, D2), dtype=jnp.float32)
    out3 = jax.block_until_ready(ssf2_forward(x2, scales2, shifts2, 0))
    ref3 = x2 * scales2[0] + shifts2[0]
    assert jnp.allclose(out3, ref3, atol=1e-6, rtol=1e-6), "mismatch (fallback path)"

    print("KERNEL_OK")
</pallas_src>

<mosaic_0001>
module attributes {stable_mosaic.version = 11 : i64} {
  func.func @ssf2_kernel(%arg0: i32, %arg1: i32, %arg2: memref<1xi32, #tpu.memory_space<smem>>, %arg3: memref<1x9x128xf32, #tpu.memory_space<vmem>>, %arg4: memref<1x9x128xf32, #tpu.memory_space<vmem>>, %arg5: memref<1x9x128xf32, #tpu.memory_space<vmem>>, %arg6: memref<1x9x128xf32, #tpu.memory_space<vmem>>) attributes {dimension_semantics = [#tpu.dimension_semantics<parallel>, #tpu.dimension_semantics<parallel>], iteration_bounds = array<i64: 1, 2>, scalar_prefetch = 1 : i64, scratch_operands = 0 : i64, tpu.core_type = #tpu.core_type<tc>, window_params = [{transform_indices = @transform_0, window_bounds = array<i64: 1, 9, 128>}, {transform_indices = @transform_1, window_bounds = array<i64: 1, 9, 128>}, {transform_indices = @transform_2, window_bounds = array<i64: 1, 9, 128>}, {transform_indices = @transform_3, window_bounds = array<i64: 1, 9, 128>}]} {
    %c0 = arith.constant 0 : index
    %c0_0 = arith.constant 0 : index
    %c0_1 = arith.constant 0 : index
    %0 = vector.load %arg3[%c0, %c0_0, %c0_1] : memref<1x9x128xf32, #tpu.memory_space<vmem>>, vector<1x9x128xf32>
    %c0_2 = arith.constant 0 : index
    %c0_3 = arith.constant 0 : index
    %c0_4 = arith.constant 0 : index
    %1 = vector.load %arg4[%c0_2, %c0_3, %c0_4] : memref<1x9x128xf32, #tpu.memory_space<vmem>>, vector<1x9x128xf32>
    %c0_5 = arith.constant 0 : index
    %c0_6 = arith.constant 0 : index
    %c0_7 = arith.constant 0 : index
    %2 = vector.load %arg5[%c0_5, %c0_6, %c0_7] : memref<1x9x128xf32, #tpu.memory_space<vmem>>, vector<1x9x128xf32>
    %3 = arith.mulf %0, %1 : vector<1x9x128xf32>
    %4 = arith.addf %3, %2 : vector<1x9x128xf32>
    %c0_8 = arith.constant 0 : index
    %c0_9 = arith.constant 0 : index
    %c0_10 = arith.constant 0 : index
    %5 = vector.load %arg6[%c0_8, %c0_9, %c0_10] : memref<1x9x128xf32, #tpu.memory_space<vmem>>, vector<1x9x128xf32>
    tpu.vector_store %arg6[%c0_8, %c0_9, %c0_10], %4 {strides = array<i32>} : memref<1x9x128xf32, #tpu.memory_space<vmem>>, vector<1x9x128xf32>,
    return
  }
  func.func @transform_0(%arg0: i32, %arg1: i32, %arg2: memref<1xi32, #tpu.memory_space<smem>>) -> (i32, i32, i32) {
    %c0_i32 = arith.constant 0 : i32
    %c0_i32_0 = arith.constant 0 : i32
    return %arg1, %arg0, %c0_i32 : i32, i32, i32
  }
  func.func @transform_1(%arg0: i32, %arg1: i32, %arg2: memref<1xi32, #tpu.memory_space<smem>>) -> (i32, i32, i32) {
    %c0 = arith.constant 0 : index
    %0 = memref.load %arg2[%c0] : memref<1xi32, #tpu.memory_space<smem>>
    %c0_i32 = arith.constant 0 : i32
    %c0_i32_0 = arith.constant 0 : i32
    return %0, %arg0, %c0_i32 : i32, i32, i32
  }
  func.func @transform_2(%arg0: i32, %arg1: i32, %arg2: memref<1xi32, #tpu.memory_space<smem>>) -> (i32, i32, i32) {
    %c0 = arith.constant 0 : index
    %0 = memref.load %arg2[%c0] : memref<1xi32, #tpu.memory_space<smem>>
    %c0_i32 = arith.constant 0 : i32
    %c0_i32_0 = arith.constant 0 : i32
    return %0, %arg0, %c0_i32 : i32, i32, i32
  }
  func.func @transform_3(%arg0: i32, %arg1: i32, %arg2: memref<1xi32, #tpu.memory_space<smem>>) -> (i32, i32, i32) {
    %c0_i32 = arith.constant 0 : i32
    %c0_i32_0 = arith.constant 0 : i32
    return %arg1, %arg0, %c0_i32 : i32, i32, i32
  }
}

</mosaic_0001>

<bundles_post_ra>
// kernel: tpu_custom_call.1
= control target key start
LH: loop header
LB: loop body
LE: loop exit
PB: predicated region body
PF: predicated region fallthrough
CT: control target
= control target key end

     0   :  { %s534_s17 = smov 0   ;;  %s536_s18 = smov 0   ;;  %s573_s0 = inlined_call_operand.<no memory space> [shape: s32[1], index: 0, kind: input, shape index: {}]   ;;  %s574_s1 = inlined_call_operand.vmem [shape: f32[2,9,128], index: 1, kind: input, shape index: {}]   ;;  %s575_s2 = inlined_call_operand.vmem [shape: f32[3,9,128], index: 2, kind: input, shape index: {}]   ;;  %s576_s3 = inlined_call_operand.vmem [shape: f32[3,9,128], index: 3, kind: input, shape index: {}]   ;;  %s577_s4 = inlined_call_operand.vmem [shape: f32[2,9,128], index: 4, kind: output, shape index: {}]  }
   0x1   :  { %9 = sst [smem:[#allocation3]] %s573_s0  ;;  %s538_s19 = smov 0  }
   0x2 LB: > { %s24_s0 = sadd.s32 1, %s500_s18  ;;  %p443_p0 = scmp.ge.s32.totalorder %s504_s19, 1  ;;  %s504_s19 = sphi %s538_s19, %s15_s19   ;;  %s500_s18 = sphi %s536_s18, %s579_s18   ;;  %s496_s17 = sphi %s534_s17, %s578_s17  }
   0x3   : > { %p25_p1 = scmp.ge.s32.totalorder %s24_s0, 2  ;;  %p202_p2 = scmp.lt.s32.totalorder %s504_s19, 3 }
   0x5   : > { %s581_s0 = smov (%p25_p1, %s24_s0), 0  ;;  %p203_p3 = pnand %p443_p0, %p202_p2 }
   0x6   : > { %p255_p4 = scmp.lt.s32.totalorder (!%p203_p3), %s496_s17, 1  ;;  %s264_s20 = sld [smem:[#allocation3]] (!%p203_p3) }
   0x7   : > { %206 = sbr.rel (%p203_p3) target bundleno = 24 (0x18), region = 32 }
   0xc   : > { %p266_p5 = scmp.lt.s32.totalorder (!%p203_p3), %s264_s20, 2 }
   0xe   : > { %s583_s17 = smov (!%p255_p4, %s496_s17), 1  ;;  %s585_s20 = smov (!%p266_p5, %s264_s20), 2 }
   0xf   : > { %s454_s21 = sshll.u32 %s583_s17, 4  ;;  %s455_s25 = sshll.u32 %s585_s20, 4 }
  0x10   : > { %s262_s24 = scalar_lea.vmem %s574_s1, %s454_s21  ;;  %s273_s28 = scalar_lea.vmem %s575_s2, %s455_s25 }
  0x11   : > { %v298_v0 = vld [vmem:[%s262_s24] sm:$0xff]  ;;  %v299_v1 = vld [vmem:[%s262_s24 + $0x8] sm:$0x1]  ;;  %s285_s5 = scalar_lea.vmem %s576_s3, %s455_s25  ;;  %s296_s8 = scalar_lea.vmem %s577_s4, %s454_s21 }
  0x12   : > { %v300_v2 = vld [vmem:[%s273_s28] sm:$0xff]  ;;  %v301_v4 = vld [vmem:[%s273_s28 + $0x8] sm:$0x1] }
  0x13   : > { %v302_v3 = vld [vmem:[%s285_s5] sm:$0xff]  ;;  %v304_v5 = vmul.f32 %v300_v2, %v298_v0  ;;  %v303_v6 = vld [vmem:[%s285_s5 + $0x8] sm:$0x1]  ;;  %v305_v7 = vmul.f32 %v301_v4, %v299_v1 }
  0x15   : > { %v306_v8 = vadd.f32 %v304_v5, %v302_v3  ;;  %v307_v9 = vadd.f32 %v305_v7, %v303_v6 }
  0x17   : > { %308 = vst [vmem:[%s296_s8] sm:$0xff] %v306_v8  ;;  %309 = vst [vmem:[%s296_s8 + $0x8] sm:$0x1] %v307_v9 }
  0x18 PF: > { %s15_s19 = sadd.s32 1, %s504_s19   ;;  %s578_s17 = smov %s500_s18 }
  0x19   : > { %p12_p6 = scmp.ge.s32.totalorder %s15_s19, 4   ;;  %s579_s18 = smov %s581_s0 }
  0x1b   :  { %14 = sbr.rel (!%p12_p6) target bundleno = 2 (0x2), region = 68 }

</bundles_post_ra>
